<compile_context>
chip_gen: v7x
topology: tpu7x:2x2x1
jax: 0.10.0
libtpu: 0.0.40
codegen_flags: <defaults>
</compile_context>

<pallas_src>
import functools

import jax
import jax.numpy as jnp
from jax.experimental import pallas as pl
from jax.experimental.pallas import tpu as pltpu


_EPS = 0.2
_OUT_SUB, _OUT_LANE = 8, 128  # minimal aligned f32 block for per-tile partial sums


def _smoothed_ce_kernel(pred_ref, gold_ref, out_ref, *, n_valid_rows, eps):
    """One batch tile of label-smoothed cross entropy.

    pred_ref : (TB, C)   logits tile, native dtype (upcast to f32 in-register)
    gold_ref : (TB, 1)   int32 class ids
    out_ref  : (8, 128)  f32 — this tile's partial loss sum, broadcast over block
    """
    tile = pl.program_id(0)
    pred = pred_ref[...].astype(jnp.float32)              # (TB, C) f32
    gold = gold_ref[...]                                   # (TB, 1) i32
    tb, c = pred.shape

    # Row-validity mask: the last tile may extend past the true batch size.
    row_ids = tile * tb + jax.lax.broadcasted_iota(jnp.int32, (tb, 1), 0)
    valid = row_ids < n_valid_rows                          # (TB, 1) bool

    # Numerically stable log-softmax pieces (per row).
    m = jnp.max(pred, axis=1, keepdims=True)                # (TB, 1)
    shifted = pred - m
    lse = jnp.log(jnp.sum(jnp.exp(shifted), axis=1, keepdims=True))  # (TB, 1)

    # Smoothed one-hot weights via a single select.  Since sum_c w_c == 1:
    #   loss_row = -sum_c w_c * (shifted_c - lse) = lse - sum_c w_c * shifted_c
    class_ids = jax.lax.broadcasted_iota(jnp.int32, (tb, c), 1)
    w = jnp.where(class_ids == gold, 1.0 - eps, eps / (c - 1))        # (TB, C)
    loss_row = lse - jnp.sum(w * shifted, axis=1, keepdims=True)      # (TB, 1)

    # Partial (un-normalized) sum for this tile; padded rows contribute 0.
    tile_sum = jnp.sum(jnp.where(valid, loss_row, 0.0))
    out_ref[...] = jnp.zeros_like(out_ref) + tile_sum


def get_loss_pallas(pred, target, *, block_rows=1024):
    """Label-smoothed CE loss (eps=0.2), matching get_loss.forward.

    pred   : (B, C) float logits (any float dtype; upcast to f32 in-kernel)
    target : (B,)   integer class ids
    returns scalar float32 loss
    """
    b, c = pred.shape
    gold = target.reshape(b, 1).astype(jnp.int32)

    if b <= block_rows:
        tb = b                                   # single tile: block == full array
    else:
        assert block_rows % 8 == 0, "block_rows must be a multiple of 8"
        tb = block_rows
    num_tiles = pl.cdiv(b, tb)

    kernel = functools.partial(_smoothed_ce_kernel, n_valid_rows=b, eps=_EPS)

    itemsize = jnp.dtype(pred.dtype).itemsize
    cost = pl.CostEstimate(
        flops=int(6 * b * c),
        transcendentals=int(b * c + b),
        bytes_accessed=int(b * c * itemsize + b * 4
                           + num_tiles * _OUT_SUB * _OUT_LANE * 4),
    )

    partials = pl.pallas_call(
        kernel,
        out_shape=jax.ShapeDtypeStruct((num_tiles * _OUT_SUB, _OUT_LANE),
                                       jnp.float32),
        grid=(num_tiles,),
        in_specs=[
            pl.BlockSpec((tb, c), lambda i: (i, 0)),
            pl.BlockSpec((tb, 1), lambda i: (i, 0)),
        ],
        out_specs=pl.BlockSpec((_OUT_SUB, _OUT_LANE), lambda i: (i, 0)),
        compiler_params=pltpu.CompilerParams(
            dimension_semantics=("parallel",)),
        cost_estimate=cost,
    )(pred, gold)

    # Tiny final reduction + mean in plain JAX: one scalar per tile.
    return jnp.sum(partials[::_OUT_SUB, 0]) / jnp.float32(b)


def _reference_loss(pred, target):
    """Pure-JAX reference mirroring the PyTorch module."""
    _, c = pred.shape
    eps = _EPS
    one_hot = jax.nn.one_hot(target, c, dtype=jnp.float32)
    smoothed = one_hot * (1.0 - eps) + (1.0 - one_hot) * (eps / (c - 1))
    log_prb = jax.nn.log_softmax(pred.astype(jnp.float32), axis=1)
    return -(smoothed * log_prb).sum(axis=1).mean()


if __name__ == "__main__":
    key = jax.random.PRNGKey(0)
    k1, k2 = jax.random.split(key)

    B, C = 20, 16  # small: 20 samples, 16 classes
    pred = jax.random.normal(k1, (B, C), dtype=jnp.float32)
    target = jax.random.randint(k2, (B,), 0, C, dtype=jnp.int32)

    # block_rows=8 -> 3 tiles with a partial remainder tile (20 = 2*8 + 4),
    # exercising the tiled/pipelined path and the row masking.
    loss = get_loss_pallas(pred, target, block_rows=8)
    jax.block_until_ready(loss)
    ref = _reference_loss(pred, target)
    assert jnp.allclose(loss, ref, atol=1e-5, rtol=1e-5), (loss, ref)

    # bf16 logits: no wrapper-side upcast; kernel upcasts to f32 in-register.
    pred_bf16 = pred.astype(jnp.bfloat16)
    loss_bf16 = get_loss_pallas(pred_bf16, target, block_rows=8)
    jax.block_until_ready(loss_bf16)
    ref_bf16 = _reference_loss(pred_bf16, target)
    assert jnp.allclose(loss_bf16, ref_bf16, atol=1e-4, rtol=1e-4), (loss_bf16, ref_bf16)

    print("KERNEL_OK")
</pallas_src>

<mosaic_0001>
module attributes {stable_mosaic.version = 11 : i64} {
  func.func @_smoothed_ce_kernel(%arg0: i32, %arg1: memref<8x16xf32, #tpu.memory_space<vmem>>, %arg2: memref<8x1xi32, #tpu.memory_space<vmem>>, %arg3: memref<8x128xf32, #tpu.memory_space<vmem>>) attributes {dimension_semantics = [#tpu.dimension_semantics<parallel>], iteration_bounds = array<i64: 3>, scalar_prefetch = 0 : i64, scratch_operands = 0 : i64, tpu.core_type = #tpu.core_type<tc>, window_params = [{transform_indices = @transform_0, window_bounds = array<i64: 8, 16>}, {transform_indices = @transform_1, window_bounds = array<i64: 8, 1>}, {transform_indices = @transform_2, window_bounds = array<i64: 8, 128>}]} {
    %c0 = arith.constant 0 : index
    %c0_0 = arith.constant 0 : index
    %0 = vector.load %arg1[%c0, %c0_0] : memref<8x16xf32, #tpu.memory_space<vmem>>, vector<8x16xf32>
    %c0_1 = arith.constant 0 : index
    %c0_2 = arith.constant 0 : index
    %1 = vector.load %arg2[%c0_1, %c0_2] : memref<8x1xi32, #tpu.memory_space<vmem>>, vector<8x1xi32>
    %c8_i32 = arith.constant 8 : i32
    %2 = arith.muli %arg0, %c8_i32 : i32
    %3 = tpu.iota {dimensions = array<i32: 0>} : vector<8x1xi32>
    %4 = vector.broadcast %2 : i32 to vector<8x1xi32>
    %5 = arith.addi %4, %3 : vector<8x1xi32>
    %c20_i32 = arith.constant 20 : i32
    %6 = vector.broadcast %c20_i32 : i32 to vector<8x1xi32>
    %7 = arith.cmpi slt, %5, %6 : vector<8x1xi32>
    %cst = arith.constant dense<0xFF800000> : vector<8xf32>
    %8 = vector.multi_reduction <maximumf>, %0, %cst [1] : vector<8x16xf32> to vector<8xf32>
    %9 = vector.shape_cast %8 : vector<8xf32> to vector<8x1xf32>
    %10 = vector.broadcast %9 : vector<8x1xf32> to vector<8x16xf32>
    %11 = arith.subf %0, %10 : vector<8x16xf32>
    %12 = math.exp %11 : vector<8x16xf32>
    %cst_3 = arith.constant dense<0.000000e+00> : vector<8xf32>
    %13 = vector.multi_reduction <add>, %12, %cst_3 [1] : vector<8x16xf32> to vector<8xf32>
    %14 = vector.shape_cast %13 : vector<8xf32> to vector<8x1xf32>
    %15 = math.log %14 : vector<8x1xf32>
    %16 = tpu.iota {dimensions = array<i32: 1>} : vector<8x16xi32>
    %17 = vector.broadcast %1 : vector<8x1xi32> to vector<8x16xi32>
    %18 = arith.cmpi eq, %16, %17 : vector<8x16xi32>
    %cst_4 = arith.constant 8.000000e-01 : f32
    %cst_5 = arith.constant 0.0133333337 : f32
    %19 = vector.broadcast %cst_4 : f32 to vector<8x16xf32>
    %20 = vector.broadcast %cst_5 : f32 to vector<8x16xf32>
    %21 = arith.select %18, %19, %20 : vector<8x16xi1>, vector<8x16xf32>
    %22 = arith.mulf %21, %11 : vector<8x16xf32>
    %cst_6 = arith.constant dense<0.000000e+00> : vector<8xf32>
    %23 = vector.multi_reduction <add>, %22, %cst_6 [1] : vector<8x16xf32> to vector<8xf32>
    %24 = vector.shape_cast %23 : vector<8xf32> to vector<8x1xf32>
    %25 = arith.subf %15, %24 : vector<8x1xf32>
    %cst_7 = arith.constant 0.000000e+00 : f32
    %26 = vector.broadcast %cst_7 : f32 to vector<8x1xf32>
    %27 = arith.select %7, %25, %26 : vector<8x1xi1>, vector<8x1xf32>
    %28 = vector.shape_cast %27 : vector<8x1xf32> to vector<1x8x1xf32>
    %cst_8 = arith.constant dense<0.000000e+00> : vector<1xf32>
    %29 = vector.multi_reduction <add>, %28, %cst_8 [1, 2] : vector<1x8x1xf32> to vector<1xf32>
    %30 = vector.shape_cast %29 : vector<1xf32> to vector<1x1x1xf32>
    %31 = vector.extract %30[0, 0, 0] : f32 from vector<1x1x1xf32>
    %cst_9 = arith.constant 0.000000e+00 : f32
    %32 = vector.broadcast %cst_9 : f32 to vector<8x128xf32>
    %33 = vector.broadcast %31 : f32 to vector<8x128xf32>
    %34 = arith.addf %32, %33 : vector<8x128xf32>
    %c0_10 = arith.constant 0 : index
    %c0_11 = arith.constant 0 : index
    %35 = vector.load %arg3[%c0_10, %c0_11] : memref<8x128xf32, #tpu.memory_space<vmem>>, vector<8x128xf32>
    tpu.vector_store %arg3[%c0_10, %c0_11], %34 {strides = array<i32>} : memref<8x128xf32, #tpu.memory_space<vmem>>, vector<8x128xf32>,
    return
  }
  func.func @transform_0(%arg0: i32) -> (i32, i32) {
    %c0_i32 = arith.constant 0 : i32
    %c0_i32_0 = arith.constant 0 : i32
    return %arg0, %c0_i32 : i32, i32
  }
  func.func @transform_1(%arg0: i32) -> (i32, i32) {
    %c0_i32 = arith.constant 0 : i32
    %c0_i32_0 = arith.constant 0 : i32
    return %arg0, %c0_i32 : i32, i32
  }
  func.func @transform_2(%arg0: i32) -> (i32, i32) {
    %c0_i32 = arith.constant 0 : i32
    %c0_i32_0 = arith.constant 0 : i32
    return %arg0, %c0_i32 : i32, i32
  }
}

</mosaic_0001>

<bundles_post_ra>
// kernel: tpu_custom_call.1
= control target key start
LH: loop header
LB: loop body
LE: loop exit
PB: predicated region body
PF: predicated region fallthrough
CT: control target
= control target key end

     0   :  { %7 = vsyncpa [#allocation3], 0  ;;  %s537_s0 = inlined_call_operand.vmem [shape: f32[20,16], index: 0, kind: input, shape index: {}]   ;;  %s538_s1 = inlined_call_operand.vmem [shape: s32[20,1], index: 1, kind: input, shape index: {}]   ;;  %s539_s2 = inlined_call_operand.hbm [shape: f32[24,128], index: 2, kind: output, shape index: {}]  }
   0x1   :  { %9 = vsyncpa [#allocation3 + $0x1], 0  ;;  %s430_s9 = smov 0   ;;  %s432_s10 = smov 0  }
   0x2   :  { %s434_s11 = smov 0   ;;  %s436_s12 = smov 0  }
   0x3 LB: > { %s451_s13 = sadd.s32 4294967295, %s410_s12   ;;  %s288_s14 = sadd.s32 4294967294, %s410_s12   ;;  %s410_s12 = sphi %s436_s12, %s545_s12   ;;  %s406_s11 = sphi %s434_s11, %s544_s11   ;;  %s402_s10 = sphi %s432_s10, %s543_s10   ;;  %s398_s9 = sphi %s430_s9, %s542_s9  }
   0x4   : > { %s455_s15 = sadd.s32 1, %s410_s12   ;;  %s74_s16 = sadd.s32 1, %s406_s11 }
   0x5   : > { %s71_s17 = ssub.s32 %s410_s12, %s455_s15  ;;  %p84_p0 = scmp.ne.s32.totalorder %s406_s11, %s402_s10 }
   0x6   : > { %p72_p1 = scmp.eq.s32.totalorder %s71_s17, 0  ;;  %p85_p2 = scmp.eq.s32.totalorder %s451_s13, 2 }
   0x7   : > { %p90_p3 = scmp.ne.s32.totalorder %s402_s10, %s398_s9  ;;  %p91_p4 = scmp.eq.s32.totalorder %s288_s14, 2 }
   0x8   : > { %s466_s18 = scalar_select %p72_p1, %s406_s11, %s74_s16  }
   0x9   : > { %p468_p5 = por %p85_p2, %p84_p0  ;;  %p472_p6 = por %p91_p4, %p90_p3 }
   0xa   : > { %p291_p7 = scmp.ge.s32.totalorder %s410_s12, 1  ;;  %p123_p8 = scmp.lt.s32.totalorder %s410_s12, 4 }
   0xc   : > { %p124_p9 = pnand %p291_p7, %p123_p8 }
   0xd   : > { %p148_p10 = scmp.lt.s32.totalorder (!%p124_p9), %s451_s13, 2  ;;  %v412_v0 = vmov (!%p124_p9), 0   ;;  %vm164_vm0 = vcmask (!%p124_p9), 130048   ;;  %v159_v6 = vlaneseq (!%p124_p9)  ;;  %v413_v10 = vmov (!%p124_p9), 0.013333334   ;;  %s295_s29 = sshll.u32 (!%p124_p9), %s451_s13, 3 }
   0xe   : > { %127 = sbr.rel (%p124_p9) target bundleno = 563 (0x233), region = 28  ;;  %343 = vset.pattern.permute.xlu0 (!%p124_p9), %v412_v0  ;;  %v161_v18 = vstv (!%p124_p9), %s295_s29  ;;  %vm189_vm3 = vcmask (!%p124_p9), 7168   ;;  %s145_s30 = sand.u32 (!%p124_p9), 1, %s402_s10  }
   0xf   : > { %v177_v8 = vand.u32 (!%p124_p9), 127, %v159_v6  ;;  %v160_v17 = vshrl.u32 (!%p124_p9), %v159_v6, 7  ;;  %s292_s3 = sshll.u32 (!%p124_p9), %s145_s30, 3  ;;  %s297_s6 = sshll.u32 (!%p124_p9), %s451_s13, 7 }
  0x10   : > { %s147_s4 = scalar_lea.vmem (!%p124_p9), [#allocation2], %s292_s3  ;;  %s497_s16 = scalar_lea.hbm (!%p124_p9), %s539_s2, %s297_s6 }
  0x11   : > { %v162_v19 = vadd.s32 (!%p124_p9), %v161_v18, %v160_v17  ;;  %s217_s5 = sshll.u32 (!%p124_p9), %s147_s4, 4  ;;  %s204_s17 = scalar_lea.sflag (!%p124_p9), [#allocation3], %s145_s30  ;;  %s492_s5 = int_to_ptr.vmem [resolvable:$true] %s217_s5 }
  0x13   : > { %vm163_vm2 = vcmp.lt.s32.totalorder (!%p124_p9), %v162_v19, 20 }
  0x15   : > { %s149_s21 = scalar_select %p148_p10, %s451_s13, 2 }
  0x16   : > { %s414_s13 = smov [#allocation2]  }
  0x17   : > { %s293_s22 = sshll.u32 %s149_s21, 3  ;;  %s348_s21 = scalar_lea.vmem %s492_s5, 128 }
  0x18   : > { %s151_s25 = scalar_lea.vmem %s537_s0, %s293_s22  ;;  %s155_s28 = scalar_lea.vmem %s538_s1, %s293_s22 }
  0x19   : > { %v156_v1 = vld [vmem:[%s151_s25] sm:$0xff]  ;;  %p349_p11 = scmp.ne.s32.totalorder %s492_s5, %s348_s21  ;;  %s352_s22 = sshll.u32 %s414_s13, 4  ;;  %s353_s22 = int_to_ptr.vmem [resolvable:$false] %s352_s22 }
  0x1a   : > { %v165_v2 = vsel %vm164_vm0, %v156_v1, -inf  ;;  %v157_v3 = vld [vmem:[%s155_s28] sm:$0xff]  ;;  %s354_s23 = scalar_lea.vmem %s353_s22, 256  ;;  %p355_p0 = scmp.lt.s32.totalorder %s492_s5, %s353_s22 }
  0x1b   : > { %166 = vmax.xlane.f32.xlu0 %v165_v2  ;;  %p350_p12 = pnand %p349_p11, %p468_p5  ;;  %p356_p1 = scmp.lt.s32.totalorder %s354_s23, %s348_s21 }
  0x1d   : > { %p351_p13 = pneg %p350_p12  ;;  %p357_p2 = por %p356_p1, %p355_p0 }
  0x1f   : > { %p358_p3 = pnand %p357_p2, %p351_p13 }
  0x31   : > { %179 = vperm.xlu0 %343, %v157_v3  }
  0xa8   : > { %v167_v4 = vpop.xlane.xlu0 %166 }
  0xa9   : > { %v168_v5 = vsub.f32 %v156_v1, %v167_v4 }
  0xab   : > { %v169_v7 = vmul.f32 1.442695, %v168_v5 }
  0xad   : > { %344 = vpow2.f32 %v169_v7 }
  0xb0   : > { %v180_v9 = vpop.permute.xlu0 %179 }
  0xb1   : > { %vm181_vm1 = vcmp.eq.s32.totalorder %v177_v8, %v180_v9 }
  0xb2   : > { %v182_v11 = vsel %vm181_vm1, 0.8, %v413_v10 }
  0xb3   : > { %v183_v14 = vmul.f32 %v182_v11, %v168_v5 }
  0xb5   : > { %v184_v15 = vsel %vm164_vm0, %v183_v14, 0.0 }
  0xb7   : > { %v345_v12 = vpop.eup %344 }
  0xb8   : > { %v171_v13 = vsel %vm164_vm0, %v345_v12, 0.0 }
  0xb9   : > { %172 = vadd.xlane.f32.xlu1 %v171_v13 }
  0xbd   : > { %185 = vadd.xlane.f32.xlu1 %v184_v15 }
 0x146   : > { %v173_v16 = vpop.xlane.xlu1 %172 }
 0x147   : > { %346 = vlog2.f32 %v173_v16 }
 0x14a   : > { %v186_v22 = vpop.xlane.xlu1 %185 }
 0x151   : > { %v347_v20 = vpop.eup %346 }
 0x152   : > { %v175_v21 = vmul.f32 0.6931472, %v347_v20 }
 0x154   : > { %v187_v23 = vsub.f32 %v175_v21, %v186_v22 }
 0x156   : > { %v188_v24 = vsel %vm163_vm2, %v187_v23, 0.0 }
 0x157   : > { %v190_v25 = vsel %vm189_vm3, %v188_v24, 0.0 }
 0x158   : > { %191 = vadd.xlane.f32.xlu1 %v190_v25 }
 0x1e5   : > { %v192_v26 = vpop.xlane.xlu1 %191 }
 0x1e6   : > { %v193_v27 = vrot.slane %v192_v26, 4 }
 0x1e8   : > { %v194_v28 = vadd.f32 %v193_v27, %v192_v26 }
 0x1ea   : > { %v195_v29 = vrot.slane %v194_v28, 2 }
 0x1ec   : > { %v196_v30 = vadd.f32 %v195_v29, %v194_v28 }
 0x1ee   : > { %v197_v31 = vrot.slane %v196_v30, 1 }
 0x1f0   : > { %v198_v32 = vadd.f32 %v197_v31, %v196_v30 }
 0x1f2   : > { %300 = vpush %v198_v32 }
 0x223   : > { %s301_s7 = spop %300 }
 0x224   : > { %v200_v33 = vstv %s301_s7 }
 0x225   : > { %202 = vst [vmem:[%s147_s4] sm:$0xff] %v200_v33 }
 0x226   : > { %361 = shalt.err (!%p358_p3)
}
 0x227   : > { %s362_s24 = scalar_lea.hbm %s497_s16, 128  ;;  %s366_s27 = scalar_lea.hbm %s539_s2, 384 }
 0x228   : > { %p363_p4 = scmp.ne.s32.totalorder %s497_s16, %s362_s24  ;;  %p367_p9 = scmp.lt.u32.totalorder %s497_s16, %s539_s2 }
 0x229   : > { %p368_p10 = scmp.lt.u32.totalorder %s366_s27, %s362_s24  ;;  %p370_p12 = scmp.lt.u32.totalorder %s362_s24, %s497_s16 }
 0x22a   : > { %p364_p7 = pnand %p363_p4, %p468_p5 }
 0x22b   : > { %p369_p11 = por %p368_p10, %p367_p9 }
 0x22c   : > { %p365_p8 = pneg %p364_p7 }
 0x22d   : > { %p371_p13 = por %p370_p12, %p369_p11 }
 0x22f   : > { %p372_p0 = pnand %p371_p13, %p365_p8 }
 0x231   : > { %375 = shalt.err (!%p372_p0)
}
 0x232   : > { %302 = dma.vmem_to_hbm [thread:$0]  (%p468_p5), %s492_s5, 128, %s497_s16, %s204_s17  }
 0x233 PF: > { %p308_p1 = scmp.ge.s32.totalorder %s410_s12, 2  ;;  %s229_s30 = sand.u32 1, %s398_s9  }
 0x234   : > { %s230_s3 = scalar_lea.sflag [#allocation3], %s229_s30 }
 0x235   : > { %p305_p2 = pnand %p308_p1, %p472_p6 }
 0x237   : > { %393 = dma.done.wait (!%p305_p2), %s230_s3, 128  }
 0x238   : > { %395 = vsyncadd (!%p305_p2), %s230_s3, 4294967168  ;;  %p12_p3 = scmp.ge.s32.totalorder %s455_s15, 5   ;;  %s542_s9 = smov %s402_s10 }
 0x239   : > { %s543_s10 = smov %s406_s11  ;;  %s544_s11 = smov %s466_s18 }
 0x23a   : > { %s545_s12 = smov %s455_s15  ;;  %14 = sbr.rel (!%p12_p3) target bundleno = 3 (0x3), region = 66 }
 0x241   :  { %235 = vsyncpa [#allocation3], 1 }
 0x242   :  { %237 = vsyncpa [#allocation3 + $0x1], 1 }

</bundles_post_ra>
